<compile_context>
chip_gen: v7x
topology: tpu7x:2x2x1
jax: 0.10.0
libtpu: 0.0.40
codegen_flags: <defaults>
</compile_context>

<pallas_src>
import functools

import jax
import jax.numpy as jnp
from jax.experimental import pallas as pl
from jax.experimental.pallas import tpu as pltpu

_MAX_TILE = 1024  # batch-tile cap: amortize ~0.35us/step grid overhead


def _round_up(n, m):
    return ((n + m - 1) // m) * m


def _pick_batch_tile(batch, requested=None):
    """Pick the batch tile.

    - requested: rounded up to a multiple of 8 (f32 sublane), capped at batch.
    - auto, batch <= _MAX_TILE: single full-batch block (any size is legal).
    - auto, batch >  _MAX_TILE: an *even* number of near-equal tiles so the
      "parallel" axis splits evenly across v7x's two TensorCores, while each
      tile stays large enough to amortize per-step overhead on v5e/v6e.
    """
    if requested is not None:
        tb = _round_up(max(1, int(requested)), 8)
        return batch if tb >= batch else tb
    if batch <= _MAX_TILE:
        return batch
    steps = pl.cdiv(batch, _MAX_TILE)
    steps += steps & 1                      # force an even number of grid steps
    tb = _round_up(pl.cdiv(batch, steps), 8)
    return batch if tb >= batch else tb


def qnet_kernel(x_ref, w1_ref, b1_ref, w2_ref, b2_ref, w3_ref, b3_ref, o_ref):
    """Fused 3-layer MLP: relu(relu(x@W1+b1)@W2+b2)@W3+b3.

    Inputs arrive in f32; bf16 casts for the MXU happen in-kernel (VPU work
    hidden under the DMA).  Accumulation, bias-add and ReLU run in f32.
    """
    x = x_ref[...].astype(jnp.bfloat16)                      # (tb, S)

    h = jnp.dot(x, w1_ref[...].astype(jnp.bfloat16),
                preferred_element_type=jnp.float32)
    h = jnp.maximum(h + b1_ref[...], 0.0)                    # f32 (tb, 64)

    h = jnp.dot(h.astype(jnp.bfloat16), w2_ref[...].astype(jnp.bfloat16),
                preferred_element_type=jnp.float32)
    h = jnp.maximum(h + b2_ref[...], 0.0)                    # f32 (tb, 64)

    out = jnp.dot(h.astype(jnp.bfloat16), w3_ref[...].astype(jnp.bfloat16),
                  preferred_element_type=jnp.float32) + b3_ref[...]
    o_ref[...] = out.astype(o_ref.dtype)                     # (tb, A) direct store


@functools.partial(jax.jit, static_argnames=("batch_tile",))
def qnet_forward(x, w1, b1, w2, b2, w3, b3, *, batch_tile=None):
    """QNet forward via a single pallas_call.

    x:  (B, state_size) float32
    w1: (state_size, 64), b1: (1, 64)
    w2: (64, 64),         b2: (1, 64)
    w3: (64, action_size), b3: (1, action_size)
    returns (B, action_size) float32
    """
    B, S = x.shape
    H1 = w1.shape[1]
    H2 = w2.shape[1]
    A = w3.shape[1]

    tb = _pick_batch_tile(B, batch_tile)
    grid = (pl.cdiv(B, tb),)
    const = lambda i: (0, 0)   # grid-invariant blocks: VMEM-resident, no re-DMA

    return pl.pallas_call(
        qnet_kernel,
        out_shape=jax.ShapeDtypeStruct((B, A), x.dtype),
        grid=grid,
        in_specs=[
            pl.BlockSpec((tb, S), lambda i: (i, 0)),   # x batch tile (pipelined)
            pl.BlockSpec((S, H1), const),              # W1
            pl.BlockSpec((1, H1), const),              # b1
            pl.BlockSpec((H1, H2), const),             # W2
            pl.BlockSpec((1, H2), const),              # b2
            pl.BlockSpec((H2, A), const),              # W3
            pl.BlockSpec((1, A), const),               # b3
        ],
        out_specs=pl.BlockSpec((tb, A), lambda i: (i, 0)),
        compiler_params=pltpu.CompilerParams(
            dimension_semantics=("parallel",),
        ),
    )(x, w1, b1, w2, b2, w3, b3)


def init_qnet_params(key, state_size, action_size, hidden=64):
    """PyTorch-Linear-style init: U(-1/sqrt(fan_in), 1/sqrt(fan_in))."""
    def linear(k, fan_in, fan_out):
        kw, kb = jax.random.split(k)
        bound = 1.0 / jnp.sqrt(jnp.asarray(fan_in, jnp.float32))
        w = jax.random.uniform(kw, (fan_in, fan_out), jnp.float32, -bound, bound)
        b = jax.random.uniform(kb, (1, fan_out), jnp.float32, -bound, bound)
        return w, b

    k1, k2, k3 = jax.random.split(key, 3)
    w1, b1 = linear(k1, state_size, hidden)
    w2, b2 = linear(k2, hidden, hidden)
    w3, b3 = linear(k3, hidden, action_size)
    return w1, b1, w2, b2, w3, b3


def qnet_reference(x, w1, b1, w2, b2, w3, b3):
    h1 = jnp.maximum(x @ w1 + b1, 0.0)
    h2 = jnp.maximum(h1 @ w2 + b2, 0.0)
    return h2 @ w3 + b3


if __name__ == "__main__":
    key = jax.random.PRNGKey(0)
    k_params, k_x1, k_x2 = jax.random.split(key, 3)

    state_size, action_size, hidden = 16, 4, 64
    params = init_qnet_params(k_params, state_size, action_size, hidden)

    # Small single-block batch (typical DQN act() call).
    x_small = jax.random.normal(k_x1, (8, state_size), jnp.float32)
    out_small = jax.block_until_ready(qnet_forward(x_small, *params))
    ref_small = qnet_reference(x_small, *params)
    assert out_small.shape == (8, action_size), out_small.shape
    assert jnp.allclose(out_small, ref_small, atol=3e-2, rtol=3e-2), (
        "small-batch mismatch vs reference")

    # Multi-tile path with a ragged last tile (forced via batch_tile).
    x_tiled = jax.random.normal(k_x2, (40, state_size), jnp.float32)
    out_tiled = jax.block_until_ready(
        qnet_forward(x_tiled, *params, batch_tile=16))
    ref_tiled = qnet_reference(x_tiled, *params)
    assert out_tiled.shape == (40, action_size), out_tiled.shape
    assert jnp.allclose(out_tiled, ref_tiled, atol=3e-2, rtol=3e-2), (
        "tiled-batch mismatch vs reference")

    print("KERNEL_OK")
</pallas_src>

<mosaic_0001>
module attributes {stable_mosaic.version = 11 : i64} {
  func.func @qnet_kernel(%arg0: i32, %arg1: memref<8x16xf32, #tpu.memory_space<vmem>>, %arg2: memref<16x64xf32, #tpu.memory_space<vmem>>, %arg3: memref<1x64xf32, #tpu.memory_space<vmem>>, %arg4: memref<64x64xf32, #tpu.memory_space<vmem>>, %arg5: memref<1x64xf32, #tpu.memory_space<vmem>>, %arg6: memref<64x4xf32, #tpu.memory_space<vmem>>, %arg7: memref<1x4xf32, #tpu.memory_space<vmem>>, %arg8: memref<8x4xf32, #tpu.memory_space<vmem>>) attributes {dimension_semantics = [#tpu.dimension_semantics<parallel>], iteration_bounds = array<i64: 1>, scalar_prefetch = 0 : i64, scratch_operands = 0 : i64, tpu.core_type = #tpu.core_type<tc>, window_params = [{transform_indices = @transform_0, window_bounds = array<i64: 8, 16>}, {pipeline_mode = #tpu.pipeline_mode<synchronous>, transform_indices = @transform_1, window_bounds = array<i64: 16, 64>}, {pipeline_mode = #tpu.pipeline_mode<synchronous>, transform_indices = @transform_2, window_bounds = array<i64: 1, 64>}, {pipeline_mode = #tpu.pipeline_mode<synchronous>, transform_indices = @transform_3, window_bounds = array<i64: 64, 64>}, {pipeline_mode = #tpu.pipeline_mode<synchronous>, transform_indices = @transform_4, window_bounds = array<i64: 1, 64>}, {pipeline_mode = #tpu.pipeline_mode<synchronous>, transform_indices = @transform_5, window_bounds = array<i64: 64, 4>}, {pipeline_mode = #tpu.pipeline_mode<synchronous>, transform_indices = @transform_6, window_bounds = array<i64: 1, 4>}, {transform_indices = @transform_7, window_bounds = array<i64: 8, 4>}]} {
    %c0 = arith.constant 0 : index
    %c0_0 = arith.constant 0 : index
    %0 = vector.load %arg1[%c0, %c0_0] : memref<8x16xf32, #tpu.memory_space<vmem>>, vector<8x16xf32>
    %1 = arith.truncf %0 : vector<8x16xf32> to vector<8x16xbf16>
    %c0_1 = arith.constant 0 : index
    %c0_2 = arith.constant 0 : index
    %2 = vector.load %arg2[%c0_1, %c0_2] : memref<16x64xf32, #tpu.memory_space<vmem>>, vector<16x64xf32>
    %3 = arith.truncf %2 : vector<16x64xf32> to vector<16x64xbf16>
    %cst = arith.constant dense<0.000000e+00> : vector<8x64xf32>
    %4 = tpu.matmul %1, %3, %cst {dimension_numbers = #tpu.dot_dimension_numbers<[1], [0], [0], [1], [0, 0, 1, 1], [], []>} : vector<8x16xbf16>, vector<16x64xbf16>, vector<8x64xf32> -> vector<8x64xf32>
    %c0_3 = arith.constant 0 : index
    %c0_4 = arith.constant 0 : index
    %5 = vector.load %arg3[%c0_3, %c0_4] : memref<1x64xf32, #tpu.memory_space<vmem>>, vector<1x64xf32>
    %6 = vector.broadcast %5 : vector<1x64xf32> to vector<8x64xf32>
    %7 = arith.addf %4, %6 : vector<8x64xf32>
    %cst_5 = arith.constant 0.000000e+00 : f32
    %8 = vector.broadcast %cst_5 : f32 to vector<8x64xf32>
    %9 = arith.maximumf %7, %8 : vector<8x64xf32>
    %10 = arith.truncf %9 : vector<8x64xf32> to vector<8x64xbf16>
    %c0_6 = arith.constant 0 : index
    %c0_7 = arith.constant 0 : index
    %11 = vector.load %arg4[%c0_6, %c0_7] : memref<64x64xf32, #tpu.memory_space<vmem>>, vector<64x64xf32>
    %12 = arith.truncf %11 : vector<64x64xf32> to vector<64x64xbf16>
    %cst_8 = arith.constant dense<0.000000e+00> : vector<8x64xf32>
    %13 = tpu.matmul %10, %12, %cst_8 {dimension_numbers = #tpu.dot_dimension_numbers<[1], [0], [0], [1], [0, 0, 1, 1], [], []>} : vector<8x64xbf16>, vector<64x64xbf16>, vector<8x64xf32> -> vector<8x64xf32>
    %c0_9 = arith.constant 0 : index
    %c0_10 = arith.constant 0 : index
    %14 = vector.load %arg5[%c0_9, %c0_10] : memref<1x64xf32, #tpu.memory_space<vmem>>, vector<1x64xf32>
    %15 = vector.broadcast %14 : vector<1x64xf32> to vector<8x64xf32>
    %16 = arith.addf %13, %15 : vector<8x64xf32>
    %cst_11 = arith.constant 0.000000e+00 : f32
    %17 = vector.broadcast %cst_11 : f32 to vector<8x64xf32>
    %18 = arith.maximumf %16, %17 : vector<8x64xf32>
    %19 = arith.truncf %18 : vector<8x64xf32> to vector<8x64xbf16>
    %c0_12 = arith.constant 0 : index
    %c0_13 = arith.constant 0 : index
    %20 = vector.load %arg6[%c0_12, %c0_13] : memref<64x4xf32, #tpu.memory_space<vmem>>, vector<64x4xf32>
    %21 = arith.truncf %20 : vector<64x4xf32> to vector<64x4xbf16>
    %cst_14 = arith.constant dense<0.000000e+00> : vector<8x4xf32>
    %22 = tpu.matmul %19, %21, %cst_14 {dimension_numbers = #tpu.dot_dimension_numbers<[1], [0], [0], [1], [0, 0, 1, 1], [], []>} : vector<8x64xbf16>, vector<64x4xbf16>, vector<8x4xf32> -> vector<8x4xf32>
    %c0_15 = arith.constant 0 : index
    %c0_16 = arith.constant 0 : index
    %23 = vector.load %arg7[%c0_15, %c0_16] : memref<1x4xf32, #tpu.memory_space<vmem>>, vector<1x4xf32>
    %24 = vector.broadcast %23 : vector<1x4xf32> to vector<8x4xf32>
    %25 = arith.addf %22, %24 : vector<8x4xf32>
    %c0_17 = arith.constant 0 : index
    %c0_18 = arith.constant 0 : index
    %26 = vector.load %arg8[%c0_17, %c0_18] : memref<8x4xf32, #tpu.memory_space<vmem>>, vector<8x4xf32>
    tpu.vector_store %arg8[%c0_17, %c0_18], %25 {strides = array<i32>} : memref<8x4xf32, #tpu.memory_space<vmem>>, vector<8x4xf32>,
    return
  }
  func.func @transform_0(%arg0: i32) -> (i32, i32) {
    %c0_i32 = arith.constant 0 : i32
    %c0_i32_0 = arith.constant 0 : i32
    return %arg0, %c0_i32 : i32, i32
  }
  func.func @transform_1(%arg0: i32) -> (i32, i32) {
    %c0_i32 = arith.constant 0 : i32
    %c0_i32_0 = arith.constant 0 : i32
    %c0_i32_1 = arith.constant 0 : i32
    return %c0_i32, %c0_i32_0 : i32, i32
  }
  func.func @transform_2(%arg0: i32) -> (i32, i32) {
    %c0_i32 = arith.constant 0 : i32
    %c0_i32_0 = arith.constant 0 : i32
    %c0_i32_1 = arith.constant 0 : i32
    return %c0_i32, %c0_i32_0 : i32, i32
  }
  func.func @transform_3(%arg0: i32) -> (i32, i32) {
    %c0_i32 = arith.constant 0 : i32
    %c0_i32_0 = arith.constant 0 : i32
    %c0_i32_1 = arith.constant 0 : i32
    return %c0_i32, %c0_i32_0 : i32, i32
  }
  func.func @transform_4(%arg0: i32) -> (i32, i32) {
    %c0_i32 = arith.constant 0 : i32
    %c0_i32_0 = arith.constant 0 : i32
    %c0_i32_1 = arith.constant 0 : i32
    return %c0_i32, %c0_i32_0 : i32, i32
  }
  func.func @transform_5(%arg0: i32) -> (i32, i32) {
    %c0_i32 = arith.constant 0 : i32
    %c0_i32_0 = arith.constant 0 : i32
    %c0_i32_1 = arith.constant 0 : i32
    return %c0_i32, %c0_i32_0 : i32, i32
  }
  func.func @transform_6(%arg0: i32) -> (i32, i32) {
    %c0_i32 = arith.constant 0 : i32
    %c0_i32_0 = arith.constant 0 : i32
    %c0_i32_1 = arith.constant 0 : i32
    return %c0_i32, %c0_i32_0 : i32, i32
  }
  func.func @transform_7(%arg0: i32) -> (i32, i32) {
    %c0_i32 = arith.constant 0 : i32
    %c0_i32_0 = arith.constant 0 : i32
    return %arg0, %c0_i32 : i32, i32
  }
}

</mosaic_0001>

<bundles_post_ra>
// kernel: qnet_forward.1
= control target key start
LH: loop header
LB: loop body
LE: loop exit
PB: predicated region body
PF: predicated region fallthrough
CT: control target
= control target key end

     0   :  { %12 = vsyncpa [#allocation3], 0  ;;  %s310_s24 = smov [#allocation2]   ;;  %s435_s0 = inlined_call_operand.vmem [shape: f32[8,16], index: 0, kind: input, shape index: {}]   ;;  %s436_s1 = inlined_call_operand.hbm [shape: f32[16,64], index: 1, kind: input, shape index: {}]   ;;  %s437_s2 = inlined_call_operand.vmem [shape: f32[1,64], index: 2, kind: input, shape index: {}]   ;;  %s438_s3 = inlined_call_operand.vmem [shape: f32[64,64], index: 3, kind: input, shape index: {}]   ;;  %s439_s4 = inlined_call_operand.vmem [shape: f32[1,64], index: 4, kind: input, shape index: {}]   ;;  %s440_s5 = inlined_call_operand.vmem [shape: f32[64,4], index: 5, kind: input, shape index: {}]   ;;  %s441_s6 = inlined_call_operand.vmem [shape: f32[1,4], index: 6, kind: input, shape index: {}]   ;;  %s442_s7 = inlined_call_operand.vmem [shape: f32[8,4], index: 7, kind: output, shape index: {}]  }
   0x1   :  { %s20_s25 = sshll.u32 %s310_s24, 4  ;;  %s286_s28 = scalar_lea.hbm %s436_s1, 256  ;;  %s21_s25 = int_to_ptr.vmem [resolvable:$true] %s20_s25 }
   0x2   :  { %p287_p0 = scmp.ne.s32.totalorder %s436_s1, %s286_s28  ;;  %p290_p1 = scmp.lt.u32.totalorder %s286_s28, %s436_s1 }
   0x4   :  { %p292_p2 = pnand %p290_p1, %p287_p0 }
   0x6   :  { %295 = shalt.err (!%p292_p2)
}
   0x7   :  { %s296_s10 = scalar_lea.vmem %s21_s25, 256  ;;  %p301_p4 = scmp.lt.s32.totalorder %s21_s25, %s21_s25 }
   0x8   :  { %p297_p3 = scmp.ne.s32.totalorder %s21_s25, %s296_s10  ;;  %p302_p5 = scmp.lt.s32.totalorder %s296_s10, %s296_s10 }
   0xa   :  { %p303_p6 = por %p302_p5, %p301_p4 }
   0xc   :  { %p304_p7 = pnand %p303_p6, %p297_p3 }
   0xe   :  { %307 = shalt.err (!%p304_p7)
}
   0xf   :  { %s311_s11 = smov 128   ;;  %s312_s12 = smov 8  }
  0x10   :  { %26 = dma.hbm_to_vmem [thread:$0]  %s436_s1, 256, %s21_s25, [#allocation3], %s311_s11, %s311_s11, %s312_s12  }
  0x11   :  { %308 = dma.done.wait [#allocation3], 256  }
  0x12   :  { %309 = vsyncadd [#allocation3], 4294967040  ;;  %v313_v0 = vmov 0.0   ;;  %vm314_vm0 = vmmov 0   ;;  %v43_v1 = vld [vmem:[#allocation2] sm:$0xff]  ;;  %v44_v2 = vld [vmem:[#allocation2 + $0x8] sm:$0xff] }
  0x13   :  { %251 = vmatprep.subr.bf16.mxu0 %v313_v0  ;;  %253 = vmatprep.mubr.msk.bf16.mxu0 %vm314_vm0, %v313_v0  ;;  %v41_v3 = vld [vmem:[%s435_s0] sm:$0xff]  ;;  %v45_v4 = vpack.c.bf16 %v44_v2, %v43_v1  ;;  %v100_v6 = vld [vmem:[%s438_s3 + $0x8] sm:$0xff]  ;;  %v101_v7 = vld [vmem:[%s438_s3 + $0x10] sm:$0xff]  ;;  %vm53_vm1 = vcmask 130048   ;;  %vm118_vm2 = vcmask 523264   ;;  %vm226_vm3 = vcmask 31744  }
  0x14   :  { %257 = vmatprep.subr.bf16.mxu1 %v313_v0  ;;  %265 = vmatprep.mubr.msk.bf16.mxu1 %vm314_vm0, %v313_v0  ;;  %v99_v5 = vld [vmem:[%s438_s3] sm:$0xff]  ;;  %v42_v8 = vpack.c.bf16 %v41_v3, %v41_v3  ;;  %v102_v10 = vld [vmem:[%s438_s3 + $0x18] sm:$0xff]  ;;  %v104_v13 = vld [vmem:[%s438_s3 + $0x28] sm:$0xff] }
  0x15   :  { %v107_v9 = vpack.c.bf16 %v100_v6, %v99_v5  ;;  %252 = vmatpush3.bf16.msra.mxu0 %v45_v4  ;;  %v108_v11 = vpack.c.bf16 %v102_v10, %v101_v7  ;;  %v103_v12 = vld [vmem:[%s438_s3 + $0x20] sm:$0xff]  ;;  %v105_v15 = vld [vmem:[%s438_s3 + $0x30] sm:$0xff]  ;;  %v106_v16 = vld [vmem:[%s438_s3 + $0x38] sm:$0xff] }
  0x16   :  { %269 = vmatprep.subr.bf16.mxu0 %v313_v0  ;;  %v109_v14 = vpack.c.bf16 %v104_v13, %v103_v12  ;;  %v110_v17 = vpack.c.bf16 %v106_v16, %v105_v15  ;;  %v164_v18 = vld [vmem:[%s440_s5] sm:$0xff]  ;;  %v165_v19 = vld [vmem:[%s440_s5 + $0x8] sm:$0xff]  ;;  %v166_v20 = vld [vmem:[%s440_s5 + $0x10] sm:$0xff] }
  0x17   :  { %258 = vmatpush3.bf16.msra.mxu1 %v107_v9  ;;  %v172_v21 = vpack.c.bf16 %v165_v19, %v164_v18  ;;  %v167_v22 = vld [vmem:[%s440_s5 + $0x18] sm:$0xff]  ;;  %v233_v24 = vld [vmem:[%s437_s2] ss:$0 sm:$0xff]  ;;  %v169_v33 = vld [vmem:[%s440_s5 + $0x28] sm:$0xff] }
  0x18   :  { %259 = vmatprep.subr.bf16.mxu1 %v313_v0  ;;  %254 = vmatmul.mubr.msk.bf16.vlgmr.msra.gmra.mrb[0].mxu0 %vm53_vm1, %v42_v8  ;;  %v173_v23 = vpack.c.bf16 %v167_v22, %v166_v20  ;;  %v168_v32 = vld [vmem:[%s440_s5 + $0x20] sm:$0xff]  ;;  %v170_v35 = vld [vmem:[%s440_s5 + $0x30] sm:$0xff]  ;;  %v171_v36 = vld [vmem:[%s440_s5 + $0x38] sm:$0xff] }
  0x19   :  { %277 = vmatprep.mubr.msk.bf16.mxu0 %vm314_vm0, %v313_v0  ;;  %270 = vmatpush3.bf16.msra.mxu0 %v172_v21  ;;  %v174_v34 = vpack.c.bf16 %v169_v33, %v168_v32  ;;  %v175_v37 = vpack.c.bf16 %v171_v36, %v170_v35  ;;  %v235_v38 = vld [vmem:[%s439_s4] ss:$0 sm:$0xff] }
  0x1a   :  { %271 = vmatprep.subr.bf16.mxu0 %v313_v0  ;;  %v237_v46 = vld [vmem:[%s441_s6] ss:$0 sm:$0xff] }
  0x1b   :  { %260 = vmatpush3.bf16.msra.mxu1 %v108_v11 }
  0x1c   :  { %261 = vmatprep.subr.bf16.mxu1 %v313_v0 }
  0x1d   :  { %272 = vmatpush3.bf16.msra.mxu0 %v173_v23 }
  0x1e   :  { %273 = vmatprep.subr.bf16.mxu0 %v313_v0 }
  0x1f   :  { %262 = vmatpush3.bf16.msra.mxu1 %v109_v14 }
  0x20   :  { %263 = vmatprep.subr.bf16.mxu1 %v313_v0 }
  0x21   :  { %274 = vmatpush3.bf16.msra.mxu0 %v174_v34 }
  0x22   :  { %275 = vmatprep.subr.bf16.mxu0 %v313_v0 }
  0x23   :  { %264 = vmatpush3.bf16.msra.mxu1 %v110_v17 }
  0x25   :  { %276 = vmatpush3.bf16.msra.mxu0 %v175_v37 }
  0xeb   :  { %v91_v25 = vpop.f32.mrb[0].mxu0 }
  0xec   :  { %v92_v26 = vadd.f32 %v233_v24, %v91_v25  ;;  %v255_v27 = vpop.f32.mrb[1].mxu0 }
  0xed   :  { %v94_v28 = vpop.f32.mrb[2].mxu0 }
  0xee   :  { %v97_v29 = vmax.f32 %v92_v26, 0.0  ;;  %v256_v30 = vpop.f32.mrb[3].mxu0 }
  0xf0   :  { %v98_v31 = vpack.c.bf16 %v97_v29, %v97_v29 }
  0xf2   :  { %266 = vmatmul.mubr.msk.bf16.vlgmr.msra.gmra.mrb[0].mxu1 %vm118_vm2, %v98_v31 }
 0x1c5   :  { %v156_v39 = vpop.f32.mrb[0].mxu1 }
 0x1c6   :  { %v157_v40 = vadd.f32 %v235_v38, %v156_v39  ;;  %v267_v41 = vpop.f32.mrb[1].mxu1 }
 0x1c7   :  { %v159_v42 = vpop.f32.mrb[2].mxu1 }
 0x1c8   :  { %v162_v43 = vmax.f32 %v157_v40, 0.0  ;;  %v268_v44 = vpop.f32.mrb[3].mxu1 }
 0x1ca   :  { %v163_v45 = vpack.c.bf16 %v162_v43, %v162_v43 }
 0x1cc   :  { %278 = vmatmul.mubr.msk.bf16.vlgmr.msra.gmra.mrb[4].mxu0 %vm118_vm2, %v163_v45 }
 0x29f   :  { %v220_v47 = vpop.f32.mrb[4].mxu0 }
 0x2a0   :  { %v221_v48 = vadd.f32 %v237_v46, %v220_v47  ;;  %v279_v49 = vpop.f32.mrb[5].mxu0 }
 0x2a1   :  { %v223_v50 = vpop.f32.mrb[6].mxu0 }
 0x2a2   :  { %227 = vst.msk [vmem:[%s442_s7] sm:$0xff] %vm226_vm3, %v221_v48  ;;  %v280_v51 = vpop.f32.mrb[7].mxu0 }
 0x2a3   :  { %232 = vsyncpa [#allocation3], 1 }

</bundles_post_ra>
